<compile_context>
chip_gen: v6e
topology: v6e:2x2x1
jax: 0.10.0
libtpu: 0.0.40
codegen_flags: <defaults>
</compile_context>

<pallas_src>
import jax
import jax.numpy as jnp
from jax.experimental import pallas as pl
from jax.experimental.pallas import tpu as pltpu


# ---------------------------------------------------------------------------
# Pallas kernel
# ---------------------------------------------------------------------------

def _linear_kernel(x_ref, w_ref, b_ref, o_ref, acc_ref):
    """Grid = (dout tiles [parallel], din tiles [arbitrary/reduction]).

    x: [B, tk]   w: [tk, tn]   b: [1, tn]   o/acc: [B, tn]
    """
    k = pl.program_id(1)

    @pl.when(k == 0)
    def _():
        acc_ref[...] = jnp.zeros_like(acc_ref)

    acc_ref[...] += jnp.dot(x_ref[...], w_ref[...],
                            preferred_element_type=jnp.float32)

    @pl.when(k == pl.num_programs(1) - 1)
    def _():
        o_ref[...] = (acc_ref[...] + b_ref[...]).astype(o_ref.dtype)


# ---------------------------------------------------------------------------
# Wrapper
# ---------------------------------------------------------------------------

def _round_up(x, m):
    return (x + m - 1) // m * m


def _pick_tile(dim, max_tile):
    """Largest multiple-of-128 divisor of `dim` (itself a mult. of 128) <= max_tile."""
    t = min(dim, max(128, (max_tile // 128) * 128))
    t = (t // 128) * 128
    while dim % t:
        t -= 128
    return t


def _vmem_limit_bytes():
    try:
        cap = int(pltpu.get_tpu_info().vmem_capacity_bytes)
    except Exception:
        cap = 64 * 1024 * 1024          # v7x per-TC VMEM (smallest generation)
    return max(32 * 1024 * 1024, min(cap - 16 * 1024 * 1024, 96 * 1024 * 1024))


def linear(x, w_oi, b, *, weight_dtype=None):
    """PyTorch nn.Linear semantics: y = x @ w_oi.T + b.

    x: [B, Din] float32, w_oi: [Dout, Din] (PyTorch layout), b: [Dout].
    """
    bsz, din = x.shape
    dout = w_oi.shape[0]

    # ---- pad to (sublane=8, lane=128) friendly shapes ----------------------
    bsz_p = _round_up(bsz, 8)
    din_p = _round_up(din, 128)
    dout_p = _round_up(dout, 128)

    xp = jnp.zeros((bsz_p, din_p), jnp.float32).at[:bsz, :din].set(
        x.astype(jnp.float32))
    wt = jnp.zeros((din_p, dout_p), jnp.float32).at[:din, :dout].set(
        jnp.transpose(w_oi).astype(jnp.float32))
    bp = jnp.zeros((1, dout_p), jnp.float32).at[0, :dout].set(
        b.astype(jnp.float32))
    if weight_dtype is not None:          # optional low-precision streaming
        wt = wt.astype(weight_dtype)
        xp = xp.astype(weight_dtype)

    # ---- tile selection (double-buffered weight block << VMEM budget) ------
    vmem_limit = _vmem_limit_bytes()
    wbytes = jnp.dtype(wt.dtype).itemsize
    blk_budget = vmem_limit // 6
    tn = _pick_tile(dout_p, 1024)
    tk = _pick_tile(din_p, max(128, blk_budget // (tn * wbytes)))
    nj, nk = dout_p // tn, din_p // tk

    out = pl.pallas_call(
        _linear_kernel,
        out_shape=jax.ShapeDtypeStruct((bsz_p, dout_p), jnp.float32),
        grid_spec=pltpu.PrefetchScalarGridSpec(
            num_scalar_prefetch=0,
            grid=(nj, nk),
            in_specs=[
                pl.BlockSpec((bsz_p, tk), lambda j, k: (0, k)),
                pl.BlockSpec((tk, tn), lambda j, k: (k, j)),
                pl.BlockSpec((1, tn), lambda j, k: (0, j)),
            ],
            out_specs=pl.BlockSpec((bsz_p, tn), lambda j, k: (0, j)),
            scratch_shapes=[pltpu.VMEM((bsz_p, tn), jnp.float32)],
        ),
        compiler_params=pltpu.CompilerParams(
            dimension_semantics=("parallel", "arbitrary"),
            vmem_limit_bytes=vmem_limit,
        ),
    )(xp, wt, bp)

    return out[:bsz, :dout]


# ---------------------------------------------------------------------------
# LogReg module (deterministic synthetic parameters, PyTorch-style init)
# ---------------------------------------------------------------------------

def init_params(key, input_dim, output_dim):
    wkey, bkey = jax.random.split(key)
    bound = 1.0 / float(input_dim) ** 0.5
    w = jax.random.uniform(wkey, (output_dim, input_dim), jnp.float32,
                           -bound, bound)
    b = jax.random.uniform(bkey, (output_dim,), jnp.float32, -bound, bound)
    return {"w": w, "b": b}


def logreg_forward(params, x):
    # LogReg.forward: just the linear layer (no activation in the module).
    return linear(x, params["w"], params["b"])


if __name__ == "__main__":
    key = jax.random.PRNGKey(0)
    pkey, xkey = jax.random.split(key)

    # Small MNIST-like logistic regression: batch=8, input_dim=784, output_dim=10
    batch, input_dim, output_dim = 8, 784, 10
    params = init_params(pkey, input_dim, output_dim)
    x = jax.random.normal(xkey, (batch, input_dim), jnp.float32)

    fwd = jax.jit(logreg_forward)
    out = jax.block_until_ready(fwd(params, x))

    ref = x @ params["w"].T + params["b"]
    assert out.shape == (batch, output_dim), out.shape
    assert bool(jnp.all(jnp.isfinite(out)))
    assert bool(jnp.allclose(out, ref, atol=2e-3, rtol=2e-3)), \
        float(jnp.max(jnp.abs(out - ref)))
    print("KERNEL_OK")
</pallas_src>

<mosaic_0001>
module attributes {stable_mosaic.version = 11 : i64} {
  func.func @_linear_kernel(%arg0: i32, %arg1: i32, %arg2: memref<8x896xf32, #tpu.memory_space<vmem>>, %arg3: memref<896x128xf32, #tpu.memory_space<vmem>>, %arg4: memref<1x128xf32, #tpu.memory_space<vmem>>, %arg5: memref<8x128xf32, #tpu.memory_space<vmem>>, %arg6: memref<8x128xf32, #tpu.memory_space<vmem>>) attributes {dimension_semantics = [#tpu.dimension_semantics<parallel>, #tpu.dimension_semantics<arbitrary>], iteration_bounds = array<i64: 1, 1>, scalar_prefetch = 0 : i64, scratch_operands = 1 : i64, tpu.core_type = #tpu.core_type<tc>, window_params = [{transform_indices = @transform_0, window_bounds = array<i64: 8, 896>}, {transform_indices = @transform_1, window_bounds = array<i64: 896, 128>}, {transform_indices = @transform_2, window_bounds = array<i64: 1, 128>}, {transform_indices = @transform_3, window_bounds = array<i64: 8, 128>}]} {
    %c0_i32 = arith.constant 0 : i32
    %0 = arith.cmpi eq, %arg1, %c0_i32 : i32
    %1 = arith.extui %0 : i1 to i32
    %c0_i32_0 = arith.constant 0 : i32
    %2 = arith.cmpi ne, %1, %c0_i32_0 : i32
    scf.if %2 {
      %cst_10 = arith.constant 0.000000e+00 : f32
      %12 = vector.broadcast %cst_10 : f32 to vector<8x128xf32>
      %c0_11 = arith.constant 0 : index
      %c0_12 = arith.constant 0 : index
      %13 = vector.load %arg6[%c0_11, %c0_12] : memref<8x128xf32, #tpu.memory_space<vmem>>, vector<8x128xf32>
      tpu.vector_store %arg6[%c0_11, %c0_12], %12 {strides = array<i32>} : memref<8x128xf32, #tpu.memory_space<vmem>>, vector<8x128xf32>,
    } else {
    }
    %c0 = arith.constant 0 : index
    %c0_1 = arith.constant 0 : index
    %3 = vector.load %arg6[%c0, %c0_1] : memref<8x128xf32, #tpu.memory_space<vmem>>, vector<8x128xf32>
    %c0_2 = arith.constant 0 : index
    %c0_3 = arith.constant 0 : index
    %4 = vector.load %arg2[%c0_2, %c0_3] : memref<8x896xf32, #tpu.memory_space<vmem>>, vector<8x896xf32>
    %c0_4 = arith.constant 0 : index
    %c0_5 = arith.constant 0 : index
    %5 = vector.load %arg3[%c0_4, %c0_5] : memref<896x128xf32, #tpu.memory_space<vmem>>, vector<896x128xf32>
    %cst = arith.constant dense<0.000000e+00> : vector<8x128xf32>
    %6 = tpu.matmul %4, %5, %cst {dimension_numbers = #tpu.dot_dimension_numbers<[1], [0], [0], [1], [0, 0, 1, 1], [], []>} : vector<8x896xf32>, vector<896x128xf32>, vector<8x128xf32> -> vector<8x128xf32>
    %7 = arith.addf %3, %6 : vector<8x128xf32>
    %c0_6 = arith.constant 0 : index
    %c0_7 = arith.constant 0 : index
    %8 = vector.load %arg6[%c0_6, %c0_7] : memref<8x128xf32, #tpu.memory_space<vmem>>, vector<8x128xf32>
    tpu.vector_store %arg6[%c0_6, %c0_7], %7 {strides = array<i32>} : memref<8x128xf32, #tpu.memory_space<vmem>>, vector<8x128xf32>,
    %c0_i32_8 = arith.constant 0 : i32
    %9 = arith.cmpi eq, %arg1, %c0_i32_8 : i32
    %10 = arith.extui %9 : i1 to i32
    %c0_i32_9 = arith.constant 0 : i32
    %11 = arith.cmpi ne, %10, %c0_i32_9 : i32
    scf.if %11 {
      %c0_10 = arith.constant 0 : index
      %c0_11 = arith.constant 0 : index
      %12 = vector.load %arg6[%c0_10, %c0_11] : memref<8x128xf32, #tpu.memory_space<vmem>>, vector<8x128xf32>
      %c0_12 = arith.constant 0 : index
      %c0_13 = arith.constant 0 : index
      %13 = vector.load %arg4[%c0_12, %c0_13] : memref<1x128xf32, #tpu.memory_space<vmem>>, vector<1x128xf32>
      %14 = vector.broadcast %13 : vector<1x128xf32> to vector<8x128xf32>
      %15 = arith.addf %12, %14 : vector<8x128xf32>
      %c0_14 = arith.constant 0 : index
      %c0_15 = arith.constant 0 : index
      %16 = vector.load %arg5[%c0_14, %c0_15] : memref<8x128xf32, #tpu.memory_space<vmem>>, vector<8x128xf32>
      tpu.vector_store %arg5[%c0_14, %c0_15], %15 {strides = array<i32>} : memref<8x128xf32, #tpu.memory_space<vmem>>, vector<8x128xf32>,
    } else {
    }
    return
  }
  func.func @transform_0(%arg0: i32, %arg1: i32) -> (i32, i32) {
    %c0_i32 = arith.constant 0 : i32
    %c0_i32_0 = arith.constant 0 : i32
    return %c0_i32, %arg1 : i32, i32
  }
  func.func @transform_1(%arg0: i32, %arg1: i32) -> (i32, i32) {
    %c0_i32 = arith.constant 0 : i32
    return %arg1, %arg0 : i32, i32
  }
  func.func @transform_2(%arg0: i32, %arg1: i32) -> (i32, i32) {
    %c0_i32 = arith.constant 0 : i32
    %c0_i32_0 = arith.constant 0 : i32
    return %c0_i32, %arg0 : i32, i32
  }
  func.func @transform_3(%arg0: i32, %arg1: i32) -> (i32, i32) {
    %c0_i32 = arith.constant 0 : i32
    %c0_i32_0 = arith.constant 0 : i32
    return %c0_i32, %arg0 : i32, i32
  }
}

</mosaic_0001>

<bundles_post_ra>
// kernel: logreg_forward.1
= control target key start
LH: loop header
LB: loop body
LE: loop exit
PB: predicated region body
PF: predicated region fallthrough
CT: control target
= control target key end

     0   :  { %s1035_s0 = inlined_call_operand.vmem [shape: f32[8,896], index: 0, kind: input, shape index: {}]   ;;  %s1036_s1 = inlined_call_operand.vmem [shape: f32[896,128], index: 1, kind: input, shape index: {}]   ;;  %s1037_s2 = inlined_call_operand.vmem [shape: f32[1,128], index: 2, kind: input, shape index: {}]   ;;  %s1038_s3 = inlined_call_operand.hbm [shape: f32[8,128], index: 3, kind: output, shape index: {}]  }
   0x1   :  { %v59_v0 = vld [vmem:[%s1036_s1 + $0xf8] sm:$0xff]  ;;  %v58_v4 = vld [vmem:[%s1036_s1 + $0xf0] sm:$0xff]  ;;  %v57_v8 = vld [vmem:[%s1036_s1 + $0xe8] sm:$0xff] }
   0x2   :  { %v91_v1 = vld [vmem:[%s1036_s1 + $0x1f8] sm:$0xff]  ;;  %450 = vmatprep.subr.mxu0 %v59_v0  ;;  %v90_v5 = vld [vmem:[%s1036_s1 + $0x1f0] sm:$0xff]  ;;  %v89_v9 = vld [vmem:[%s1036_s1 + $0x1e8] sm:$0xff] }
   0x3   :  { %v43_v2 = vld [vmem:[%s1036_s1 + $0x78] sm:$0xff]  ;;  %485 = vmatprep.subr.mxu1 %v91_v1  ;;  %v42_v6 = vld [vmem:[%s1036_s1 + $0x70] sm:$0xff]  ;;  %v41_v10 = vld [vmem:[%s1036_s1 + $0x68] sm:$0xff] }
   0x4   :  { %v75_v3 = vld [vmem:[%s1036_s1 + $0x178] sm:$0xff]  ;;  %451 = vmatpush3.msra.mxu0 %v43_v2  ;;  %v74_v7 = vld [vmem:[%s1036_s1 + $0x170] sm:$0xff]  ;;  %v73_v11 = vld [vmem:[%s1036_s1 + $0x168] sm:$0xff] }
   0x5   :  { %486 = vmatpush3.msra.mxu1 %v75_v3  ;;  %452 = vmatprep.subr.mxu0 %v58_v4  ;;  %v56_v12 = vld [vmem:[%s1036_s1 + $0xe0] sm:$0xff]  ;;  %v55_v16 = vld [vmem:[%s1036_s1 + $0xd8] sm:$0xff]  ;;  %v54_v20 = vld [vmem:[%s1036_s1 + $0xd0] sm:$0xff] }
   0x6   :  { %487 = vmatprep.subr.mxu1 %v90_v5  ;;  %453 = vmatpush3.msra.mxu0 %v42_v6  ;;  %v88_v13 = vld [vmem:[%s1036_s1 + $0x1e0] sm:$0xff]  ;;  %v87_v17 = vld [vmem:[%s1036_s1 + $0x1d8] sm:$0xff]  ;;  %v86_v21 = vld [vmem:[%s1036_s1 + $0x1d0] sm:$0xff] }
   0x7   :  { %488 = vmatpush3.msra.mxu1 %v74_v7  ;;  %454 = vmatprep.subr.mxu0 %v57_v8  ;;  %v40_v14 = vld [vmem:[%s1036_s1 + $0x60] sm:$0xff]  ;;  %v39_v18 = vld [vmem:[%s1036_s1 + $0x58] sm:$0xff]  ;;  %v38_v22 = vld [vmem:[%s1036_s1 + $0x50] sm:$0xff] }
   0x8   :  { %489 = vmatprep.subr.mxu1 %v89_v9  ;;  %v72_v15 = vld [vmem:[%s1036_s1 + $0x160] sm:$0xff]  ;;  %455 = vmatpush3.msra.mxu0 %v41_v10  ;;  %v71_v19 = vld [vmem:[%s1036_s1 + $0x158] sm:$0xff]  ;;  %v70_v23 = vld [vmem:[%s1036_s1 + $0x150] sm:$0xff]  ;;  %v632_v9 = vmov 0.0  }
   0x9   :  { %490 = vmatpush3.msra.mxu1 %v73_v11  ;;  %456 = vmatprep.subr.mxu0 %v56_v12  ;;  %v53_v24 = vld [vmem:[%s1036_s1 + $0xc8] sm:$0xff]  ;;  %v52_v28 = vld [vmem:[%s1036_s1 + $0xc0] sm:$0xff]  ;;  %v51_v32 = vld [vmem:[%s1036_s1 + $0xb8] sm:$0xff] }
   0xa   :  { %491 = vmatprep.subr.mxu1 %v88_v13  ;;  %457 = vmatpush3.msra.mxu0 %v40_v14  ;;  %v85_v25 = vld [vmem:[%s1036_s1 + $0x1c8] sm:$0xff]  ;;  %v84_v29 = vld [vmem:[%s1036_s1 + $0x1c0] sm:$0xff]  ;;  %v83_v33 = vld [vmem:[%s1036_s1 + $0x1b8] sm:$0xff] }
   0xb   :  { %492 = vmatpush3.msra.mxu1 %v72_v15  ;;  %458 = vmatprep.subr.mxu0 %v55_v16  ;;  %v37_v26 = vld [vmem:[%s1036_s1 + $0x48] sm:$0xff]  ;;  %v36_v30 = vld [vmem:[%s1036_s1 + $0x40] sm:$0xff]  ;;  %v35_v34 = vld [vmem:[%s1036_s1 + $0x38] sm:$0xff] }
   0xc   :  { %493 = vmatprep.subr.mxu1 %v87_v17  ;;  %459 = vmatpush3.msra.mxu0 %v39_v18  ;;  %v69_v27 = vld [vmem:[%s1036_s1 + $0x148] sm:$0xff]  ;;  %v68_v31 = vld [vmem:[%s1036_s1 + $0x140] sm:$0xff]  ;;  %v67_v35 = vld [vmem:[%s1036_s1 + $0x138] sm:$0xff] }
   0xd   :  { %494 = vmatpush3.msra.mxu1 %v71_v19  ;;  %460 = vmatprep.subr.mxu0 %v54_v20  ;;  %v50_v36 = vld [vmem:[%s1036_s1 + $0xb0] sm:$0xff]  ;;  %v49_v40 = vld [vmem:[%s1036_s1 + $0xa8] sm:$0xff]  ;;  %v48_v44 = vld [vmem:[%s1036_s1 + $0xa0] sm:$0xff] }
   0xe   :  { %495 = vmatprep.subr.mxu1 %v86_v21  ;;  %461 = vmatpush3.msra.mxu0 %v38_v22  ;;  %v82_v37 = vld [vmem:[%s1036_s1 + $0x1b0] sm:$0xff]  ;;  %v81_v41 = vld [vmem:[%s1036_s1 + $0x1a8] sm:$0xff]  ;;  %v80_v45 = vld [vmem:[%s1036_s1 + $0x1a0] sm:$0xff] }
   0xf   :  { %496 = vmatpush3.msra.mxu1 %v70_v23  ;;  %462 = vmatprep.subr.mxu0 %v53_v24  ;;  %v34_v38 = vld [vmem:[%s1036_s1 + $0x30] sm:$0xff]  ;;  %v33_v42 = vld [vmem:[%s1036_s1 + $0x28] sm:$0xff]  ;;  %v32_v46 = vld [vmem:[%s1036_s1 + $0x20] sm:$0xff] }
  0x10   :  { %497 = vmatprep.subr.mxu1 %v85_v25  ;;  %463 = vmatpush3.msra.mxu0 %v37_v26  ;;  %v66_v39 = vld [vmem:[%s1036_s1 + $0x130] sm:$0xff]  ;;  %v65_v43 = vld [vmem:[%s1036_s1 + $0x128] sm:$0xff]  ;;  %v64_v47 = vld [vmem:[%s1036_s1 + $0x120] sm:$0xff] }
  0x11   :  { %498 = vmatpush3.msra.mxu1 %v69_v27  ;;  %464 = vmatprep.subr.mxu0 %v52_v28  ;;  %v47_v48 = vld [vmem:[%s1036_s1 + $0x98] sm:$0xff]  ;;  %v46_v52 = vld [vmem:[%s1036_s1 + $0x90] sm:$0xff]  ;;  %v45_v56 = vld [vmem:[%s1036_s1 + $0x88] sm:$0xff] }
  0x12   :  { %499 = vmatprep.subr.mxu1 %v84_v29  ;;  %465 = vmatpush3.msra.mxu0 %v36_v30  ;;  %v79_v49 = vld [vmem:[%s1036_s1 + $0x198] sm:$0xff]  ;;  %v78_v53 = vld [vmem:[%s1036_s1 + $0x190] sm:$0xff]  ;;  %v77_v57 = vld [vmem:[%s1036_s1 + $0x188] sm:$0xff] }
  0x13   :  { %500 = vmatpush3.msra.mxu1 %v68_v31  ;;  %466 = vmatprep.subr.mxu0 %v51_v32  ;;  %v31_v50 = vld [vmem:[%s1036_s1 + $0x18] sm:$0xff]  ;;  %v30_v54 = vld [vmem:[%s1036_s1 + $0x10] sm:$0xff]  ;;  %v29_v58 = vld [vmem:[%s1036_s1 + $0x8] sm:$0xff] }
  0x14   :  { %501 = vmatprep.subr.mxu1 %v83_v33  ;;  %467 = vmatpush3.msra.mxu0 %v35_v34  ;;  %v63_v51 = vld [vmem:[%s1036_s1 + $0x118] sm:$0xff]  ;;  %v62_v55 = vld [vmem:[%s1036_s1 + $0x110] sm:$0xff]  ;;  %v61_v59 = vld [vmem:[%s1036_s1 + $0x108] sm:$0xff] }
  0x15   :  { %502 = vmatpush3.msra.mxu1 %v67_v35  ;;  %468 = vmatprep.subr.mxu0 %v50_v36  ;;  %v44_v60 = vld [vmem:[%s1036_s1 + $0x80] sm:$0xff]  ;;  %v22_v63 = vld [vmem:[%s1035_s0 + $0x8] sm:$0xff]  ;;  %v24_v1 = vld [vmem:[%s1035_s0 + $0x18] sm:$0xff] }
  0x16   :  { %503 = vmatprep.subr.mxu1 %v82_v37  ;;  %469 = vmatpush3.msra.mxu0 %v34_v38  ;;  %v76_v61 = vld [vmem:[%s1036_s1 + $0x180] sm:$0xff]  ;;  %v23_v3 = vld [vmem:[%s1035_s0 + $0x10] sm:$0xff]  ;;  %v123_v4 = vld [vmem:[%s1036_s1 + $0x2f8] sm:$0xff] }
  0x17   :  { %504 = vmatpush3.msra.mxu1 %v66_v39  ;;  %470 = vmatprep.subr.mxu0 %v49_v40  ;;  %v28_v62 = vld [vmem:[%s1036_s1] sm:$0xff]  ;;  %v107_v5 = vld [vmem:[%s1036_s1 + $0x278] sm:$0xff]  ;;  %v122_v7 = vld [vmem:[%s1036_s1 + $0x2f0] sm:$0xff] }
  0x18   :  { %505 = vmatprep.subr.mxu1 %v81_v41  ;;  %471 = vmatpush3.msra.mxu0 %v33_v42  ;;  %v60_v0 = vld [vmem:[%s1036_s1 + $0x100] sm:$0xff]  ;;  %v139_v6 = vld [vmem:[%s1036_s1 + $0x378] sm:$0xff]  ;;  %v106_v8 = vld [vmem:[%s1036_s1 + $0x270] sm:$0xff] }
  0x19   :  { %506 = vmatpush3.msra.mxu1 %v65_v43  ;;  %472 = vmatprep.subr.mxu0 %v48_v44  ;;  %v21_v2 = vld [vmem:[%s1035_s0] sm:$0xff]  ;;  %v138_v10 = vld [vmem:[%s1036_s1 + $0x370] sm:$0xff]  ;;  %v121_v11 = vld [vmem:[%s1036_s1 + $0x2e8] sm:$0xff] }
  0x1a   :  { %507 = vmatprep.subr.mxu1 %v80_v45  ;;  %473 = vmatpush3.msra.mxu0 %v32_v46  ;;  %v105_v12 = vld [vmem:[%s1036_s1 + $0x268] sm:$0xff]  ;;  %v120_v14 = vld [vmem:[%s1036_s1 + $0x2e0] sm:$0xff] }
  0x1b   :  { %508 = vmatpush3.msra.mxu1 %v64_v47  ;;  %474 = vmatprep.subr.mxu0 %v47_v48  ;;  %v137_v13 = vld [vmem:[%s1036_s1 + $0x368] sm:$0xff]  ;;  %v104_v15 = vld [vmem:[%s1036_s1 + $0x260] sm:$0xff] }
  0x1c   :  { %509 = vmatprep.subr.mxu1 %v79_v49  ;;  %475 = vmatpush3.msra.mxu0 %v31_v50  ;;  %v136_v16 = vld [vmem:[%s1036_s1 + $0x360] sm:$0xff] }
  0x1d   :  { %510 = vmatpush3.msra.mxu1 %v63_v51  ;;  %476 = vmatprep.subr.mxu0 %v46_v52 }
  0x1e   :  { %511 = vmatprep.subr.mxu1 %v78_v53  ;;  %477 = vmatpush3.msra.mxu0 %v30_v54 }
  0x1f   :  { %512 = vmatpush3.msra.mxu1 %v62_v55  ;;  %478 = vmatprep.subr.mxu0 %v45_v56 }
  0x20   :  { %513 = vmatprep.subr.mxu1 %v77_v57  ;;  %479 = vmatpush3.msra.mxu0 %v29_v58 }
  0x21   :  { %514 = vmatpush3.msra.mxu1 %v61_v59  ;;  %480 = vmatprep.subr.mxu0 %v44_v60 }
  0x22   :  { %515 = vmatprep.subr.mxu1 %v76_v61  ;;  %481 = vmatpush3.msra.mxu0 %v28_v62 }
  0x23   :  { %204 = vmatprep.mubr.f32.mxu0 %v22_v63  ;;  %516 = vmatpush3.msra.mxu1 %v60_v0 }
  0x24   :  { %274 = vmatprep.mubr.f32.mxu1 %v24_v1  ;;  %205 = vmatmul.mubr.f32.vlgmr.msra.gmra.mxu0 %v21_v2 }
  0x25   :  { %275 = vmatmul.mubr.f32.vlgmr.msra.gmra.mxu1 %v23_v3  ;;  %520 = vmatprep.subr.mxu0 %v123_v4 }
  0x26   :  { %572 = vmatprep.subr.mxu1 %v632_v9  ;;  %521 = vmatpush3.msra.mxu0 %v107_v5 }
  0x27   :  { %573 = vmatpush3.msra.mxu1 %v139_v6  ;;  %522 = vmatprep.subr.mxu0 %v122_v7 }
  0x28   :  { %574 = vmatprep.subr.mxu1 %v632_v9  ;;  %523 = vmatpush3.msra.mxu0 %v106_v8 }
  0x29   :  { %575 = vmatpush3.msra.mxu1 %v138_v10  ;;  %524 = vmatprep.subr.mxu0 %v121_v11 }
  0x2a   :  { %576 = vmatprep.subr.mxu1 %v632_v9 }
  0x2b   :  { %8 = vsyncpa [#allocation4], 0  ;;  %525 = vmatpush3.msra.mxu0 %v105_v12  ;;  %v119_v17 = vld [vmem:[%s1036_s1 + $0x2d8] sm:$0xff]  ;;  %577 = vmatpush3.msra.mxu1 %v137_v13  ;;  %v118_v20 = vld [vmem:[%s1036_s1 + $0x2d0] sm:$0xff]  ;;  %vm633_vm0 = vmmov 0   ;;  %s634_s7 = smov [#allocation3]  }
  0x2c   :  { %526 = vmatprep.subr.mxu0 %v120_v14  ;;  %v103_v18 = vld [vmem:[%s1036_s1 + $0x258] sm:$0xff]  ;;  %578 = vmatprep.subr.mxu1 %v632_v9  ;;  %v102_v21 = vld [vmem:[%s1036_s1 + $0x250] sm:$0xff]  ;;  %v117_v23 = vld [vmem:[%s1036_s1 + $0x2c8] sm:$0xff]  ;;  %s441_s8 = sshll.u32 %s634_s7, 4  ;;  %s442_s8 = int_to_ptr.vmem [resolvable:$true] %s441_s8 }
  0x2d   :  { %v135_v19 = vld [vmem:[%s1036_s1 + $0x358] sm:$0xff]  ;;  %527 = vmatpush3.msra.mxu0 %v104_v15  ;;  %579 = vmatpush3.msra.mxu1 %v136_v16  ;;  %v134_v22 = vld [vmem:[%s1036_s1 + $0x350] sm:$0xff]  ;;  %v101_v24 = vld [vmem:[%s1036_s1 + $0x248] sm:$0xff]  ;;  %s610_s9 = scalar_lea.vmem %s442_s8, 128  ;;  %p615_p1 = scmp.lt.s32.totalorder %s442_s8, %s442_s8 }
  0x2e   :  { %528 = vmatprep.subr.mxu0 %v119_v17  ;;  %580 = vmatprep.subr.mxu1 %v632_v9  ;;  %v133_v25 = vld [vmem:[%s1036_s1 + $0x348] sm:$0xff]  ;;  %v116_v26 = vld [vmem:[%s1036_s1 + $0x2c0] sm:$0xff]  ;;  %v115_v29 = vld [vmem:[%s1036_s1 + $0x2b8] sm:$0xff]  ;;  %p611_p0 = scmp.ne.s32.totalorder %s442_s8, %s610_s9  ;;  %p616_p2 = scmp.lt.s32.totalorder %s610_s9, %s610_s9 }
  0x2f   :  { %529 = vmatpush3.msra.mxu0 %v103_v18  ;;  %581 = vmatpush3.msra.mxu1 %v135_v19  ;;  %v100_v27 = vld [vmem:[%s1036_s1 + $0x240] sm:$0xff]  ;;  %v99_v30 = vld [vmem:[%s1036_s1 + $0x238] sm:$0xff]  ;;  %v114_v32 = vld [vmem:[%s1036_s1 + $0x2b0] sm:$0xff] }
  0x30   :  { %530 = vmatprep.subr.mxu0 %v118_v20  ;;  %582 = vmatprep.subr.mxu1 %v632_v9  ;;  %v132_v28 = vld [vmem:[%s1036_s1 + $0x340] sm:$0xff]  ;;  %v131_v31 = vld [vmem:[%s1036_s1 + $0x338] sm:$0xff]  ;;  %v98_v33 = vld [vmem:[%s1036_s1 + $0x230] sm:$0xff]  ;;  %p617_p3 = por %p616_p2, %p615_p1 }
  0x31   :  { %531 = vmatpush3.msra.mxu0 %v102_v21  ;;  %583 = vmatpush3.msra.mxu1 %v134_v22  ;;  %v130_v34 = vld [vmem:[%s1036_s1 + $0x330] sm:$0xff]  ;;  %v113_v35 = vld [vmem:[%s1036_s1 + $0x2a8] sm:$0xff]  ;;  %v112_v38 = vld [vmem:[%s1036_s1 + $0x2a0] sm:$0xff] }
  0x32   :  { %532 = vmatprep.subr.mxu0 %v117_v23  ;;  %584 = vmatprep.subr.mxu1 %v632_v9  ;;  %v97_v36 = vld [vmem:[%s1036_s1 + $0x228] sm:$0xff]  ;;  %v96_v39 = vld [vmem:[%s1036_s1 + $0x220] sm:$0xff]  ;;  %v111_v41 = vld [vmem:[%s1036_s1 + $0x298] sm:$0xff]  ;;  %p618_p4 = pnand %p617_p3, %p611_p0 }
  0x33   :  { %533 = vmatpush3.msra.mxu0 %v101_v24  ;;  %585 = vmatpush3.msra.mxu1 %v133_v25  ;;  %v129_v37 = vld [vmem:[%s1036_s1 + $0x328] sm:$0xff]  ;;  %v128_v40 = vld [vmem:[%s1036_s1 + $0x320] sm:$0xff]  ;;  %v95_v42 = vld [vmem:[%s1036_s1 + $0x218] sm:$0xff] }
  0x34   :  { %534 = vmatprep.subr.mxu0 %v116_v26  ;;  %586 = vmatprep.subr.mxu1 %v632_v9  ;;  %v127_v43 = vld [vmem:[%s1036_s1 + $0x318] sm:$0xff]  ;;  %v110_v44 = vld [vmem:[%s1036_s1 + $0x290] sm:$0xff]  ;;  %v26_v46 = vld [vmem:[%s1035_s0 + $0x28] sm:$0xff] }
  0x35   :  { %535 = vmatpush3.msra.mxu0 %v100_v27  ;;  %587 = vmatpush3.msra.mxu1 %v132_v28  ;;  %v94_v45 = vld [vmem:[%s1036_s1 + $0x210] sm:$0xff]  ;;  %v109_v47 = vld [vmem:[%s1036_s1 + $0x288] sm:$0xff]  ;;  %v108_v50 = vld [vmem:[%s1036_s1 + $0x280] sm:$0xff] }
  0x36   :  { %536 = vmatprep.subr.mxu0 %v115_v29  ;;  %588 = vmatprep.subr.mxu1 %v632_v9  ;;  %v126_v48 = vld [vmem:[%s1036_s1 + $0x310] sm:$0xff]  ;;  %v93_v49 = vld [vmem:[%s1036_s1 + $0x208] sm:$0xff]  ;;  %v92_v52 = vld [vmem:[%s1036_s1 + $0x200] sm:$0xff] }
  0x37   :  { %537 = vmatpush3.msra.mxu0 %v99_v30  ;;  %589 = vmatpush3.msra.mxu1 %v131_v31  ;;  %v125_v51 = vld [vmem:[%s1036_s1 + $0x308] sm:$0xff]  ;;  %v25_v53 = vld [vmem:[%s1035_s0 + $0x20] sm:$0xff]  ;;  %v27_v55 = vld [vmem:[%s1035_s0 + $0x30] sm:$0xff] }
  0x38   :  { %538 = vmatprep.subr.mxu0 %v114_v32  ;;  %590 = vmatprep.subr.mxu1 %v632_v9  ;;  %v124_v54 = vld [vmem:[%s1036_s1 + $0x300] sm:$0xff] }
  0x39   :  { %539 = vmatpush3.msra.mxu0 %v98_v33  ;;  %591 = vmatpush3.msra.mxu1 %v130_v34  ;;  %v449_v5 = vld [vmem:[%s1037_s2] ss:$0 sm:$0xff] }
  0x3a   :  { %540 = vmatprep.subr.mxu0 %v113_v35  ;;  %592 = vmatprep.subr.mxu1 %v632_v9 }
  0x3b   :  { %541 = vmatpush3.msra.mxu0 %v97_v36  ;;  %593 = vmatpush3.msra.mxu1 %v129_v37 }
  0x3c   :  { %542 = vmatprep.subr.mxu0 %v112_v38  ;;  %594 = vmatprep.subr.mxu1 %v632_v9 }
  0x3d   :  { %543 = vmatpush3.msra.mxu0 %v96_v39  ;;  %595 = vmatpush3.msra.mxu1 %v128_v40 }
  0x3e   :  { %544 = vmatprep.subr.mxu0 %v111_v41  ;;  %596 = vmatprep.subr.mxu1 %v632_v9 }
  0x3f   :  { %545 = vmatpush3.msra.mxu0 %v95_v42  ;;  %597 = vmatpush3.msra.mxu1 %v127_v43 }
  0x40   :  { %546 = vmatprep.subr.mxu0 %v110_v44  ;;  %598 = vmatprep.subr.mxu1 %v632_v9 }
  0x41   :  { %547 = vmatpush3.msra.mxu0 %v94_v45  ;;  %344 = vmatprep.mubr.f32.mxu0 %v26_v46 }
  0x42   :  { %548 = vmatprep.subr.mxu0 %v109_v47  ;;  %599 = vmatpush3.msra.mxu1 %v126_v48 }
  0x43   :  { %549 = vmatpush3.msra.mxu0 %v93_v49  ;;  %600 = vmatprep.subr.mxu1 %v632_v9 }
  0x44   :  { %550 = vmatprep.subr.mxu0 %v108_v50  ;;  %601 = vmatpush3.msra.mxu1 %v125_v51 }
  0x45   :  { %551 = vmatpush3.msra.mxu0 %v92_v52  ;;  %602 = vmatprep.subr.mxu1 %v632_v9 }
  0x46   :  { %345 = vmatmul.mubr.f32.vlgmr.msra.gmra.mxu0 %v25_v53  ;;  %603 = vmatpush3.msra.mxu1 %v124_v54 }
  0x47   :  { %604 = vmatprep.mubr.msk.f32.mxu1 %vm633_vm0, %v632_v9 }
  0x48   :  { %605 = vmatmul.mubr.f32.vlgmr.msra.gmra.mxu1 %v27_v55 }
  0xe4   :  { %v482_v56 = vpop.f32.mrf.mxu0 }
  0xe5   :  { %v517_v57 = vpop.f32.mrf.mxu1 }
  0xe6   :  { %v483_v58 = vpop.f32.mrf.mxu0 }
  0xe7   :  { %v518_v59 = vpop.f32.mrf.mxu1  ;;  %v484_v60 = vadd.f32 %v483_v58, %v482_v56 }
  0xe8   :  { %v519_v61 = vadd.f32 %v518_v59, %v517_v57 }
  0xea   :  { %v277_v1 = vadd.f32 %v519_v61, %v484_v60 }
 0x106   :  { %v552_v62 = vpop.f32.mrf.mxu0 }
 0x108   :  { %v553_v63 = vpop.f32.mrf.mxu0  ;;  %v416_v0 = vpop.f32.mrf.mxu1 }
 0x109   :  { %v554_v2 = vadd.f32 %v553_v63, %v552_v62 }
 0x10a   :  { %v606_v3 = vpop.f32.mrf.mxu1 }
 0x10b   :  { %v347_v4 = vadd.f32 %v554_v2, %v277_v1 }
 0x10d   :  { %v417_v6 = vadd.f32 %v416_v0, %v347_v4 }
 0x10f   :  { %v433_v7 = vadd.f32 %v449_v5, %v417_v6 }
 0x111   :  { %434 = vst [vmem:[#allocation3] sm:$0xff] %v433_v7 }
 0x112   :  { %621 = shalt.err (!%p618_p4)
}
 0x113   :  { %444 = dma.vmem_to_hbm [thread:$0]  %s442_s8, 128, %s1038_s3, [#allocation4]  }
 0x114   :  { %630 = dma.done.wait [#allocation4], 128  }
 0x115   :  { %631 = vsyncadd [#allocation4], 4294967168 }
 0x116   :  { %448 = vsyncpa [#allocation4], 1 }

</bundles_post_ra>
